<compile_context>
chip_gen: v5e
topology: v5e:2x2
jax: 0.10.0
libtpu: 0.0.40
codegen_flags: <defaults>
</compile_context>

<pallas_src>
import functools

import jax
import jax.numpy as jnp
from jax.experimental import pallas as pl
from jax.experimental.pallas import tpu as pltpu


# ----------------------------------------------------------------------------
# ELANFPN 'tiny' architecture constants (matches ELANFPN.ch_settings etc.)
# ----------------------------------------------------------------------------
ARCH_CH_SETTINGS = [[256, 64, 64, 128],
                    [128, 32, 32, 64],
                    [64, 64, 64, 128],
                    [128, 128, 128, 256]]
CONCAT_LIST = [-1, -2, -3, -4]
NUM_BLOCKS = 2
IN_CHANNELS = [64, 128, 64]        # channels of the (c3, c4, c5) backbone features

VMEM_LIMIT = 32 * 1024 * 1024      # safe on v5e/v6e (128 MiB) and v7x (64 MiB physical)


# ----------------------------------------------------------------------------
# Pallas kernels
# ----------------------------------------------------------------------------
def _pointwise_kernel(x_ref, w_ref, b_ref, o_ref):
    """Fused 1x1 conv + folded BN bias + SiLU on a (tm, Cin) row tile."""
    y = jnp.dot(x_ref[...], w_ref[...], preferred_element_type=jnp.float32)
    y = y + b_ref[...]                       # bias added once (hoisted, feedback #10)
    o_ref[...] = y * jax.nn.sigmoid(y)       # SiLU


def _pick_row_tile(m):
    """Largest row tile <= 1024 rows that divides M and keeps >= 2 grid steps."""
    tm = m
    while tm > 1024 and tm % 2 == 0 and (tm // 2) % 8 == 0:
        tm //= 2
    if tm == m and m % 2 == 0 and (m // 2) % 8 == 0:
        tm = m // 2                          # >= 2 parallel steps for dual-TC chips
    if tm != m and tm % 8 != 0:
        tm = m
    return tm


@functools.lru_cache(maxsize=None)
def _build_pointwise(m, cin, cout, tm):
    fn = pl.pallas_call(
        _pointwise_kernel,
        out_shape=jax.ShapeDtypeStruct((m, cout), jnp.float32),
        grid_spec=pltpu.PrefetchScalarGridSpec(
            num_scalar_prefetch=0,
            grid=(m // tm,),
            in_specs=[pl.BlockSpec((tm, cin), lambda i: (i, 0)),
                      pl.BlockSpec((cin, cout), lambda i: (0, 0)),
                      pl.BlockSpec((1, cout), lambda i: (0, 0))],
            out_specs=pl.BlockSpec((tm, cout), lambda i: (i, 0))),
        compiler_params=pltpu.CompilerParams(
            dimension_semantics=("parallel",),
            vmem_limit_bytes=VMEM_LIMIT),
    )
    return jax.jit(fn)


def conv1x1_silu(x, w, b):
    """x: (N,H,W,Cin) f32; w: (Cin,Cout); b: (1,Cout).  Batch fused into matmul M."""
    n, h, wd, cin = x.shape
    cout = w.shape[1]
    m = n * h * wd
    tm = _pick_row_tile(m)
    out = _build_pointwise(m, cin, cout, tm)(x.reshape(m, cin), w, b)
    return out.reshape(n, h, wd, cout)


def _make_conv_kernel(ho, wo, cin, cout, kh, kw):
    def kernel(x_ref, w_ref, b_ref, o_ref):
        # x_ref: (1, Hp, Wp, Cin) halo-padded image block (halo added in the wrapper,
        # so there is no scratch buffer and no in-kernel zero fill).
        acc = jnp.zeros((ho * wo, cout), jnp.float32)
        for i in range(kh):
            for j in range(kw):
                tap = x_ref[0, i:i + ho, j:j + wo, :].reshape(ho * wo, cin)
                acc = acc + jnp.dot(tap, w_ref[i * kw + j],
                                    preferred_element_type=jnp.float32)
        y = acc + b_ref[...]
        y = y * jax.nn.sigmoid(y)            # SiLU
        o_ref[0] = y.reshape(ho, wo, cout)
    return kernel


@functools.lru_cache(maxsize=None)
def _build_conv(n, hp, wp, cin, cout, kh, kw, ho, wo):
    kernel = _make_conv_kernel(ho, wo, cin, cout, kh, kw)
    fn = pl.pallas_call(
        kernel,
        out_shape=jax.ShapeDtypeStruct((n, ho, wo, cout), jnp.float32),
        grid_spec=pltpu.PrefetchScalarGridSpec(
            num_scalar_prefetch=0,
            grid=(n,),
            in_specs=[pl.BlockSpec((1, hp, wp, cin), lambda bi: (bi, 0, 0, 0)),
                      pl.BlockSpec((kh * kw, cin, cout), lambda bi: (0, 0, 0)),
                      pl.BlockSpec((1, cout), lambda bi: (0, 0))],
            out_specs=pl.BlockSpec((1, ho, wo, cout), lambda bi: (bi, 0, 0, 0))),
        compiler_params=pltpu.CompilerParams(
            dimension_semantics=("parallel",),
            vmem_limit_bytes=VMEM_LIMIT),
    )
    return jax.jit(fn)


def conv_kxk_silu(x, w_taps, b, kh, kw, pads):
    """Stride-1 Kh x Kw conv + folded BN + SiLU.  pads = (top, bottom, left, right)."""
    n, h, wd, cin = x.shape
    cout = w_taps.shape[-1]
    pt, pb, pleft, pright = pads
    ho = h + pt + pb - kh + 1
    wo = wd + pleft + pright - kw + 1
    # Zero halo added in the wrapper (layout plumbing) -> no scratch / zeroing in-kernel.
    xp = jnp.pad(x, ((0, 0), (pt, pb), (pleft, pright), (0, 0)))
    fn = _build_conv(n, h + pt + pb, wd + pleft + pright, cin, cout, kh, kw, ho, wo)
    return fn(xp, w_taps, b)


# ----------------------------------------------------------------------------
# BaseConv (conv + folded BN + SiLU) wrappers
# ----------------------------------------------------------------------------
def fold_baseconv(p, eps=1e-3):
    """Fold eval-mode BatchNorm (running stats, eps=1e-3) into conv weight/bias."""
    scale = p['gamma'] / jnp.sqrt(p['var'] + eps)
    w_hwio = jnp.transpose(p['w'], (2, 3, 1, 0)) * scale      # OIHW -> HWIO, scaled
    bias = p['beta'] - p['mean'] * scale
    return w_hwio, bias.reshape(1, -1)


def space_to_depth2(x):
    n, h, w, c = x.shape
    x = x.reshape(n, h // 2, 2, w // 2, 2, c)
    x = jnp.transpose(x, (0, 1, 3, 2, 4, 5))
    return x.reshape(n, h // 2, w // 2, 4 * c)


def rearrange_stride2_weight(w_hwio):
    """3x3 / stride-2 / pad-1 conv == 2x2 / stride-1 conv (pad top/left by 1) on the
    space-to-depth(2) input.  Returns tap-major weights of shape (4, 4*Cin, Cout)."""
    _, _, cin, cout = w_hwio.shape
    w2 = jnp.zeros((2, 2, 2, 2, cin, cout), w_hwio.dtype)     # (a, b, ph, pw, c, o)
    for a in range(2):
        for bb in range(2):
            for ph in range(2):
                for pw in range(2):
                    u, v = 2 * a + ph - 1, 2 * bb + pw - 1
                    if 0 <= u < 3 and 0 <= v < 3:
                        w2 = w2.at[a, bb, ph, pw].set(w_hwio[u, v])
    return w2.reshape(4, 4 * cin, cout)


def baseconv_pallas(p, x):
    w_hwio, bias = fold_baseconv(p)
    k, s = p['ksize'], p['stride']
    if k == 1:                                   # 1x1 stride-1
        return conv1x1_silu(x, w_hwio[0, 0], bias)
    if s == 1:                                   # 3x3 stride-1, SAME
        pad = (k - 1) // 2
        taps = w_hwio.reshape(k * k, p['cin'], p['cout'])
        return conv_kxk_silu(x, taps, bias, k, k, (pad, pad, pad, pad))
    # 3x3 stride-2, pad 1  ->  2x2 stride-1 conv on the space-to-depth input
    z = space_to_depth2(x)
    taps = rearrange_stride2_weight(w_hwio)
    return conv_kxk_silu(z, taps, bias, 2, 2, (1, 0, 1, 0))


def baseconv_ref(p, x):
    w_hwio, bias = fold_baseconv(p)
    k, s = p['ksize'], p['stride']
    pad = (k - 1) // 2
    dn = jax.lax.conv_dimension_numbers(x.shape, w_hwio.shape,
                                        ("NHWC", "HWIO", "NHWC"))
    y = jax.lax.conv_general_dilated(
        x, w_hwio, (s, s), [(pad, pad), (pad, pad)], dimension_numbers=dn,
        precision=jax.lax.Precision.HIGHEST)
    y = y + bias.reshape(1, 1, 1, -1)
    return y * jax.nn.sigmoid(y)


# ----------------------------------------------------------------------------
# Parameter construction (random, deterministic)
# ----------------------------------------------------------------------------
def make_baseconv(key, cin, cout, ksize, stride):
    kw_, kg, kb, km, kv = jax.random.split(key, 5)
    std = 1.7 / (cin * ksize * ksize) ** 0.5
    return dict(
        w=std * jax.random.normal(kw_, (cout, cin, ksize, ksize), jnp.float32),
        gamma=1.0 + 0.1 * jax.random.normal(kg, (cout,), jnp.float32),
        beta=0.1 * jax.random.normal(kb, (cout,), jnp.float32),
        mean=0.1 * jax.random.normal(km, (cout,), jnp.float32),
        var=jnp.abs(jax.random.normal(kv, (cout,), jnp.float32)) + 0.5,
        cin=cin, cout=cout, ksize=ksize, stride=stride)


def make_elanlayer(key, cin, mid1, mid2, cout):
    ks = jax.random.split(key, NUM_BLOCKS + 3)
    concat_chs = mid1 * 2 + mid2 * (len(CONCAT_LIST) - 2)
    return dict(
        conv1=make_baseconv(ks[0], cin, mid1, 1, 1),
        conv2=make_baseconv(ks[1], cin, mid1, 1, 1),
        bottlenecks=[make_baseconv(ks[2 + i], mid1 if i == 0 else mid2, mid2, 3, 1)
                     for i in range(NUM_BLOCKS)],
        conv3=make_baseconv(ks[2 + NUM_BLOCKS], concat_chs, cout, 1, 1))


def make_elanfpn_params(key):
    ks = iter(jax.random.split(key, 16))
    p = {}
    _, m1, m2, out_ch = ARCH_CH_SETTINGS[0]
    p['lateral_conv1'] = make_baseconv(next(ks), IN_CHANNELS[2], out_ch, 1, 1)
    p['route_conv1'] = make_baseconv(next(ks), IN_CHANNELS[1], out_ch, 1, 1)
    p['elan_fpn1'] = make_elanlayer(next(ks), out_ch * 2, m1, m2, out_ch)

    in_ch, m1, m2, out_ch = ARCH_CH_SETTINGS[1]
    p['lateral_conv2'] = make_baseconv(next(ks), in_ch, out_ch, 1, 1)
    p['route_conv2'] = make_baseconv(next(ks), IN_CHANNELS[0], out_ch, 1, 1)
    p['elan_fpn2'] = make_elanlayer(next(ks), out_ch * 2, m1, m2, out_ch)

    in_ch, m1, m2, out_ch = ARCH_CH_SETTINGS[2]
    p['mp_conv1'] = make_baseconv(next(ks), in_ch, out_ch, 3, 2)   # 'tiny': BaseConv 3x3/s2
    p['elan_pan1'] = make_elanlayer(next(ks), out_ch * 2, m1, m2, out_ch)

    in_ch, m1, m2, out_ch = ARCH_CH_SETTINGS[3]
    p['mp_conv2'] = make_baseconv(next(ks), in_ch, out_ch, 3, 2)
    p['elan_pan2'] = make_elanlayer(next(ks), out_ch + IN_CHANNELS[2], m1, m2, out_ch)

    out_channels = [c[-1] * 2 for c in ARCH_CH_SETTINGS[1:]]       # [128, 256, 512]
    p['repconvs'] = [make_baseconv(next(ks), oc // 2, oc, 3, 1) for oc in out_channels]
    return p


# ----------------------------------------------------------------------------
# Network composition (mirrors ELANFPN.forward / ELANLayer.forward, eval mode)
# ----------------------------------------------------------------------------
def upsample2x(x):  # nn.Upsample(scale_factor=2, mode='nearest')
    return jnp.repeat(jnp.repeat(x, 2, axis=1), 2, axis=2)


def elanlayer_apply(p, x, conv_apply):
    outs = []
    x1 = conv_apply(p['conv1'], x)
    x2 = conv_apply(p['conv2'], x)
    outs.append(x1)
    outs.append(x2)
    idx = [i + NUM_BLOCKS for i in CONCAT_LIST[:-2]]
    for i in range(NUM_BLOCKS):
        x2 = conv_apply(p['bottlenecks'][i], x2)
        if i in idx:
            outs.append(x2)
    outs = outs[::-1]
    x_all = jnp.concatenate(outs, axis=-1)        # channel concat (NHWC)
    return conv_apply(p['conv3'], x_all)


def elanfpn_apply(p, feats, conv_apply):
    c3, c4, c5 = feats                            # NHWC
    p5_lateral = conv_apply(p['lateral_conv1'], c5)
    p5_up = upsample2x(p5_lateral)
    route_c4 = conv_apply(p['route_conv1'], c4)
    f_out1 = jnp.concatenate([route_c4, p5_up], axis=-1)
    fpn_out1 = elanlayer_apply(p['elan_fpn1'], f_out1, conv_apply)

    fpn_out1_lateral = conv_apply(p['lateral_conv2'], fpn_out1)
    fpn_out1_up = upsample2x(fpn_out1_lateral)
    route_c3 = conv_apply(p['route_conv2'], c3)
    f_out2 = jnp.concatenate([route_c3, fpn_out1_up], axis=-1)
    fpn_out2 = elanlayer_apply(p['elan_fpn2'], f_out2, conv_apply)

    p_out1_down = conv_apply(p['mp_conv1'], fpn_out2)
    p_out1 = jnp.concatenate([p_out1_down, fpn_out1], axis=-1)
    pan_out1 = elanlayer_apply(p['elan_pan1'], p_out1, conv_apply)

    pan_out1_down = conv_apply(p['mp_conv2'], pan_out1)
    p_out2 = jnp.concatenate([pan_out1_down, c5], axis=-1)
    pan_out2 = elanlayer_apply(p['elan_pan2'], p_out2, conv_apply)

    pan_outs = [fpn_out2, pan_out1, pan_out2]
    return [conv_apply(p['repconvs'][i], pan_outs[i]) for i in range(3)]


# ----------------------------------------------------------------------------
# Main: small deterministic test, Pallas path vs XLA reference
# ----------------------------------------------------------------------------
if __name__ == "__main__":
    key = jax.random.PRNGKey(0)
    kp, k3, k4, k5 = jax.random.split(key, 4)
    params = make_elanfpn_params(kp)

    N = 2
    # NCHW inputs (as the PyTorch module consumes them)
    c3 = jax.random.normal(k3, (N, IN_CHANNELS[0], 32, 32), jnp.float32)
    c4 = jax.random.normal(k4, (N, IN_CHANNELS[1], 16, 16), jnp.float32)
    c5 = jax.random.normal(k5, (N, IN_CHANNELS[2], 8, 8), jnp.float32)
    # NCHW -> NHWC once in the wrapper (layout plumbing; channels on the lane axis)
    feats = [jnp.transpose(t, (0, 2, 3, 1)) for t in (c3, c4, c5)]

    outs = elanfpn_apply(params, feats, baseconv_pallas)
    for o in outs:
        o.block_until_ready()

    refs = elanfpn_apply(params, feats, baseconv_ref)
    for r in refs:
        r.block_until_ready()

    expected = [(N, 32, 32, 128), (N, 16, 16, 256), (N, 8, 8, 512)]
    for o, r, es in zip(outs, refs, expected):
        assert o.shape == es, (o.shape, es)
        err = float(jnp.max(jnp.abs(o - r)))
        assert jnp.allclose(o, r, atol=5e-3, rtol=5e-3), err

    print("KERNEL_OK")
</pallas_src>

<mosaic_0001>
module attributes {stable_mosaic.version = 11 : i64} {
  func.func @_pointwise_kernel(%arg0: i32, %arg1: memref<64x64xf32, #tpu.memory_space<vmem>>, %arg2: memref<64x128xf32, #tpu.memory_space<vmem>>, %arg3: memref<1x128xf32, #tpu.memory_space<vmem>>, %arg4: memref<64x128xf32, #tpu.memory_space<vmem>>) attributes {dimension_semantics = [#tpu.dimension_semantics<parallel>], iteration_bounds = array<i64: 2>, scalar_prefetch = 0 : i64, scratch_operands = 0 : i64, tpu.core_type = #tpu.core_type<tc>, window_params = [{transform_indices = @transform_0, window_bounds = array<i64: 64, 64>}, {pipeline_mode = #tpu.pipeline_mode<synchronous>, transform_indices = @transform_1, window_bounds = array<i64: 64, 128>}, {pipeline_mode = #tpu.pipeline_mode<synchronous>, transform_indices = @transform_2, window_bounds = array<i64: 1, 128>}, {transform_indices = @transform_3, window_bounds = array<i64: 64, 128>}]} {
    %c0 = arith.constant 0 : index
    %c0_0 = arith.constant 0 : index
    %0 = vector.load %arg1[%c0, %c0_0] : memref<64x64xf32, #tpu.memory_space<vmem>>, vector<64x64xf32>
    %c0_1 = arith.constant 0 : index
    %c0_2 = arith.constant 0 : index
    %1 = vector.load %arg2[%c0_1, %c0_2] : memref<64x128xf32, #tpu.memory_space<vmem>>, vector<64x128xf32>
    %cst = arith.constant dense<0.000000e+00> : vector<64x128xf32>
    %2 = tpu.matmul %0, %1, %cst {dimension_numbers = #tpu.dot_dimension_numbers<[1], [0], [0], [1], [0, 0, 1, 1], [], []>} : vector<64x64xf32>, vector<64x128xf32>, vector<64x128xf32> -> vector<64x128xf32>
    %c0_3 = arith.constant 0 : index
    %c0_4 = arith.constant 0 : index
    %3 = vector.load %arg3[%c0_3, %c0_4] : memref<1x128xf32, #tpu.memory_space<vmem>>, vector<1x128xf32>
    %4 = vector.broadcast %3 : vector<1x128xf32> to vector<64x128xf32>
    %5 = arith.addf %2, %4 : vector<64x128xf32>
    %6 = arith.negf %5 : vector<64x128xf32>
    %7 = math.exp %6 : vector<64x128xf32>
    %cst_5 = arith.constant 1.000000e+00 : f32
    %8 = vector.broadcast %cst_5 : f32 to vector<64x128xf32>
    %9 = arith.addf %8, %7 : vector<64x128xf32>
    %10 = arith.divf %8, %9 : vector<64x128xf32>
    %11 = arith.mulf %5, %10 : vector<64x128xf32>
    %c0_6 = arith.constant 0 : index
    %c0_7 = arith.constant 0 : index
    %12 = vector.load %arg4[%c0_6, %c0_7] : memref<64x128xf32, #tpu.memory_space<vmem>>, vector<64x128xf32>
    tpu.vector_store %arg4[%c0_6, %c0_7], %11 {strides = array<i32>} : memref<64x128xf32, #tpu.memory_space<vmem>>, vector<64x128xf32>,
    return
  }
  func.func @transform_0(%arg0: i32) -> (i32, i32) {
    %c0_i32 = arith.constant 0 : i32
    %c0_i32_0 = arith.constant 0 : i32
    return %arg0, %c0_i32 : i32, i32
  }
  func.func @transform_1(%arg0: i32) -> (i32, i32) {
    %c0_i32 = arith.constant 0 : i32
    %c0_i32_0 = arith.constant 0 : i32
    %c0_i32_1 = arith.constant 0 : i32
    return %c0_i32, %c0_i32_0 : i32, i32
  }
  func.func @transform_2(%arg0: i32) -> (i32, i32) {
    %c0_i32 = arith.constant 0 : i32
    %c0_i32_0 = arith.constant 0 : i32
    %c0_i32_1 = arith.constant 0 : i32
    return %c0_i32, %c0_i32_0 : i32, i32
  }
  func.func @transform_3(%arg0: i32) -> (i32, i32) {
    %c0_i32 = arith.constant 0 : i32
    %c0_i32_0 = arith.constant 0 : i32
    return %arg0, %c0_i32 : i32, i32
  }
}

</mosaic_0001>

<bundles_post_ra>
// kernel: tpu_custom_call.1
= control target key start
LH: loop header
LB: loop body
LE: loop exit
PB: predicated region body
PF: predicated region fallthrough
CT: control target
= control target key end

     0   :  { %8 = vsyncpa [#allocation3], 0  ;;  %s965_s0 = inlined_call_operand.vmem [shape: f32[128,64], index: 0, kind: input, shape index: {}]   ;;  %s966_s1 = inlined_call_operand.vmem [shape: f32[64,128], index: 1, kind: input, shape index: {}]   ;;  %s967_s2 = inlined_call_operand.vmem [shape: f32[1,128], index: 2, kind: input, shape index: {}]   ;;  %s968_s3 = inlined_call_operand.hbm [shape: f32[128,128], index: 3, kind: output, shape index: {}]  }
   0x1   :  { %10 = vsyncpa [#allocation3 + $0x1], 0  ;;  %s717_s12 = smov 0   ;;  %s719_s13 = smov 0  }
   0x2   :  { %s721_s14 = smov 0   ;;  %s723_s15 = smov 0  }
   0x3 LB: > { %s738_s16 = sadd.s32 4294967295, %s693_s15   ;;  %s504_s17 = sadd.s32 4294967294, %s693_s15   ;;  %s693_s15 = sphi %s723_s15, %s982_s15   ;;  %s689_s14 = sphi %s721_s14, %s981_s14   ;;  %s685_s13 = sphi %s719_s13, %s980_s13   ;;  %s681_s12 = sphi %s717_s12, %s979_s12  }
   0x4   : > { %s742_s18 = sadd.s32 1, %s693_s15   ;;  %s91_s19 = sadd.s32 1, %s689_s14 }
   0x5   : > { %s88_s20 = ssub.s32 %s693_s15, %s742_s18  ;;  %p101_p0 = scmp.ne.s32.totalorder %s689_s14, %s685_s13 }
   0x6   : > { %p89_p1 = scmp.eq.s32.totalorder %s88_s20, 0  ;;  %p102_p2 = scmp.eq.s32.totalorder %s738_s16, 1 }
   0x7   : > { %p107_p3 = scmp.ne.s32.totalorder %s685_s13, %s681_s12  ;;  %p108_p4 = scmp.eq.s32.totalorder %s504_s17, 1 }
   0x8   : > { %s753_s21 = scalar_select %p89_p1, %s689_s14, %s91_s19  }
   0x9   : > { %p755_p5 = por %p102_p2, %p101_p0  ;;  %p759_p6 = por %p108_p4, %p107_p3 }
   0xa   : > { %p507_p7 = scmp.ge.s32.totalorder %s693_s15, 1  ;;  %p141_p8 = scmp.lt.s32.totalorder %s693_s15, 3 }
   0xc   : > { %p142_p9 = pnand %p507_p7, %p141_p8 }
   0xd   : > { %s509_s28 = sshll.u32 (!%p142_p9), %s738_s16, 3  ;;  %s162_s29 = sand.u32 (!%p142_p9), 1, %s685_s13  }
   0xe   : > { %145 = sbr.rel (%p142_p9) target bundleno = 219 (0xdb), region = 32  ;;  %p166_p10 = scmp.lt.s32.totalorder (!%p142_p9), %s509_s28, 15 }
   0xf   : > { %s849_s30 = sshll.u32 (!%p142_p9), %s162_s29, 6  ;;  %s532_s5 = sshll.u32 (!%p142_p9), %s738_s16, 6 }
  0x10   : > { %s875_s4 = scalar_lea.vmem (!%p142_p9), [#allocation2], %s849_s30  ;;  %s438_s8 = scalar_lea.hbm (!%p142_p9), %s968_s3, %s532_s5 }
  0x11   : > { %s439_s16 = sshll.u32 (!%p142_p9), %s875_s4, 4  ;;  %s441_s9 = sshll.u32 (!%p142_p9), %s438_s8, 4  ;;  %s440_s16 = int_to_ptr.vmem [resolvable:$true] %s439_s16  ;;  %s442_s9 = int_to_ptr.hbm [resolvable:$true] %s441_s9 }
  0x12   : > { %s645_s11 = sshra.s32 (!%p142_p9), %s442_s9, 4  ;;  %s646_s11 = int_to_ptr.hbm [resolvable:$true] %s645_s11 }
  0x13   : > { %v187_v0 = vld [vmem:[%s966_s1 + $0x38] sm:$0xff]  ;;  %v186_v1 = vld [vmem:[%s966_s1 + $0x30] sm:$0xff]  ;;  %v185_v2 = vld [vmem:[%s966_s1 + $0x28] sm:$0xff]  ;;  %s984_s28 = smov (!%p166_p10, %s509_s28), 15  ;;  %vm192_vm0 = vcmask 523264   ;;  %s647_s17 = scalar_lea.hbm %s646_s11, 64 }
  0x14   : > { %225 = vmatpush.msra.mxu0 %v187_v0  ;;  %533 = vmatpush.msra.mxu1 %v187_v0  ;;  %v184_v3 = vld [vmem:[%s966_s1 + $0x20] sm:$0xff]  ;;  %v183_v4 = vld [vmem:[%s966_s1 + $0x18] sm:$0xff]  ;;  %v182_v5 = vld [vmem:[%s966_s1 + $0x10] sm:$0xff]  ;;  %s510_s10 = sshll.u32 %s984_s28, 3  ;;  %p648_p11 = scmp.ne.s32.totalorder %s646_s11, %s647_s17 }
  0x15   : > { %534 = vmatpush.msra.mxu2 %v187_v0  ;;  %535 = vmatpush.msra.mxu3 %v187_v0  ;;  %v181_v6 = vld [vmem:[%s966_s1 + $0x8] sm:$0xff]  ;;  %s169_s24 = scalar_lea.vmem %s965_s0, %s510_s10  ;;  %v180_v7 = vld [vmem:[%s966_s1] sm:$0xff]  ;;  %s427_s10 = scalar_lea.sflag [#allocation3], %s162_s29 }
  0x16   : > { %226 = vmatpush.msra.mxu0 %v186_v1  ;;  %536 = vmatpush.msra.mxu1 %v186_v1  ;;  %v172_v8 = vld [vmem:[%s169_s24] sm:$0xff]  ;;  %v174_v9 = vld [vmem:[%s169_s24 + $0x10] sm:$0xff]  ;;  %v173_v12 = vld [vmem:[%s169_s24 + $0x8] sm:$0xff]  ;;  %p649_p12 = pnand %p648_p11, %p755_p5  ;;  %p652_p0 = scmp.lt.s32.totalorder %s646_s11, %s968_s3 }
  0x17   : > { %537 = vmatpush.msra.mxu2 %v186_v1  ;;  %538 = vmatpush.msra.mxu3 %v186_v1  ;;  %v176_v10 = vld [vmem:[%s169_s24 + $0x20] sm:$0xff]  ;;  %v178_v11 = vld [vmem:[%s169_s24 + $0x30] sm:$0xff]  ;;  %v175_v13 = vld [vmem:[%s169_s24 + $0x18] sm:$0xff] }
  0x18   : > { %227 = vmatpush.msra.mxu0 %v185_v2  ;;  %539 = vmatpush.msra.mxu1 %v185_v2  ;;  %v177_v14 = vld [vmem:[%s169_s24 + $0x28] sm:$0xff]  ;;  %v179_v15 = vld [vmem:[%s169_s24 + $0x38] sm:$0xff]  ;;  %v598_v16 = vld [vmem:[%s967_s2] ss:$0 sm:$0xff]  ;;  %p650_p13 = pneg %p649_p12  ;;  %s651_s24 = scalar_lea.hbm %s968_s3, 128 }
  0x19   : > { %540 = vmatpush.msra.mxu2 %v185_v2  ;;  %541 = vmatpush.msra.mxu3 %v185_v2  ;;  %p653_p1 = scmp.lt.s32.totalorder %s651_s24, %s647_s17 }
  0x1a   : > { %228 = vmatpush.msra.mxu0 %v184_v3  ;;  %542 = vmatpush.msra.mxu1 %v184_v3 }
  0x1b   : > { %543 = vmatpush.msra.mxu2 %v184_v3  ;;  %544 = vmatpush.msra.mxu3 %v184_v3  ;;  %p654_p2 = por %p653_p1, %p652_p0 }
  0x1c   : > { %229 = vmatpush.msra.mxu0 %v183_v4  ;;  %545 = vmatpush.msra.mxu1 %v183_v4 }
  0x1d   : > { %546 = vmatpush.msra.mxu2 %v183_v4  ;;  %547 = vmatpush.msra.mxu3 %v183_v4  ;;  %p655_p3 = pnand %p654_p2, %p650_p13 }
  0x1e   : > { %230 = vmatpush.msra.mxu0 %v182_v5  ;;  %548 = vmatpush.msra.mxu1 %v182_v5 }
  0x1f   : > { %549 = vmatpush.msra.mxu2 %v182_v5  ;;  %550 = vmatpush.msra.mxu3 %v182_v5 }
  0x20   : > { %231 = vmatpush.msra.mxu0 %v181_v6  ;;  %551 = vmatpush.msra.mxu1 %v181_v6 }
  0x21   : > { %552 = vmatpush.msra.mxu2 %v181_v6  ;;  %553 = vmatpush.msra.mxu3 %v181_v6 }
  0x22   : > { %232 = vmatpush.msra.mxu0 %v180_v7  ;;  %554 = vmatpush.msra.mxu1 %v180_v7 }
  0x23   : > { %555 = vmatpush.msra.mxu2 %v180_v7  ;;  %556 = vmatpush.msra.mxu3 %v180_v7 }
  0x24   : > { %511 = vmatmul.msk.f32.vlgmr.msra.gmra.mxu0 %vm192_vm0, %v172_v8  ;;  %513 = vmatmul.msk.f32.vlgmr.msra.gmra.mxu1 %vm192_vm0, %v174_v9 }
  0x25   : > { %515 = vmatmul.msk.f32.vlgmr.msra.gmra.mxu2 %vm192_vm0, %v176_v10  ;;  %517 = vmatmul.msk.f32.vlgmr.msra.gmra.mxu3 %vm192_vm0, %v178_v11 }
  0x2c   : > { %512 = vmatmul.msk.f32.gmra.mxu0 %vm192_vm0, %v173_v12  ;;  %514 = vmatmul.msk.f32.gmra.mxu1 %vm192_vm0, %v175_v13 }
  0x2d   : > { %516 = vmatmul.msk.f32.gmra.mxu2 %vm192_vm0, %v177_v14  ;;  %518 = vmatmul.msk.f32.gmra.mxu3 %vm192_vm0, %v179_v15 }
  0xa1   : > { %v234_v17 = vpop.f32.mrf.mxu0  ;;  %v240_v18 = vpop.f32.mrf.mxu1 }
  0xa2   : > { %v804_v19 = vadd.f32 %v598_v16, %v234_v17  ;;  %v806_v20 = vadd.f32 %v598_v16, %v240_v18 }
  0xa4   : > { %v519_v21 = vmul.f32 -1.442695, %v804_v19  ;;  %v521_v22 = vmul.f32 -1.442695, %v806_v20 }
  0xa6   : > { %599 = vpow2.f32 %v519_v21 }
  0xa7   : > { %601 = vpow2.f32 %v521_v22 }
  0xa8   : > { %v246_v23 = vpop.f32.mrf.mxu2  ;;  %v252_v24 = vpop.f32.mrf.mxu3 }
  0xa9   : > { %v810_v25 = vadd.f32 %v598_v16, %v246_v23  ;;  %v812_v26 = vadd.f32 %v598_v16, %v252_v24  ;;  %v237_v27 = vpop.f32.mrf.mxu0  ;;  %v243_v28 = vpop.f32.mrf.mxu1 }
  0xaa   : > { %v814_v29 = vadd.f32 %v598_v16, %v237_v27  ;;  %v816_v30 = vadd.f32 %v598_v16, %v243_v28 }
  0xab   : > { %v523_v31 = vmul.f32 -1.442695, %v810_v25  ;;  %v525_v32 = vmul.f32 -1.442695, %v812_v26 }
  0xac   : > { %v600_v33 = vpop.eup %599  ;;  %v520_v36 = vmul.f32 -1.442695, %v814_v29  ;;  %v522_v38 = vmul.f32 -1.442695, %v816_v30 }
  0xad   : > { %v602_v34 = vpop.eup %601  ;;  %v282_v35 = vadd.f32 1.0, %v600_v33  ;;  %603 = vpow2.f32 %v523_v31 }
  0xae   : > { %v284_v37 = vadd.f32 1.0, %v602_v34  ;;  %605 = vpow2.f32 %v525_v32 }
  0xaf   : > { %607 = vrcp.f32 %v282_v35  ;;  %v299_v47 = vand.u32 2147483647, %v282_v35  ;;  %v301_v48 = vand.u32 2147483648, %v282_v35  ;;  %vm295_vm1 = vweird.f32 %v282_v35 }
  0xb0   : > { %609 = vrcp.f32 %v284_v37  ;;  %v249_v39 = vpop.f32.mrf.mxu2  ;;  %v255_v40 = vpop.f32.mrf.mxu3  ;;  %v329_v55 = vand.u32 2147483647, %v284_v37  ;;  %vm325_vm2 = vweird.f32 %v284_v37  ;;  %v331_v59 = vand.u32 2147483648, %v284_v37 }
  0xb1   : > { %611 = vpow2.f32 %v520_v36  ;;  %v822_v41 = vadd.f32 %v598_v16, %v249_v39  ;;  %v824_v43 = vadd.f32 %v598_v16, %v255_v40  ;;  %vm835_vm3 = vcmp.eq.f32.partialorder %v299_v47, 8.507059e+37 }
  0xb2   : > { %613 = vpow2.f32 %v522_v38  ;;  %v302_v61 = vor.u32 1.1754944e-38, %v301_v48  ;;  %vm843_vm6 = vcmp.eq.f32.partialorder %v329_v55, 8.507059e+37  ;;  %v332_v6 = vor.u32 1.1754944e-38, %v331_v59 }
  0xb3   : > { %v604_v42 = vpop.eup %603  ;;  %v524_v50 = vmul.f32 -1.442695, %v822_v41  ;;  %v526_v56 = vmul.f32 -1.442695, %v824_v43 }
  0xb4   : > { %v606_v44 = vpop.eup %605  ;;  %v826_v45 = vadd.f32 1.0, %v604_v42 }
  0xb5   : > { %v608_v46 = vpop.eup %607  ;;  %v828_v49 = vadd.f32 1.0, %v606_v44 }
  0xb6   : > { %v610_v51 = vpop.eup %609  ;;  %v291_v52 = vmul.f32 %v608_v46, %v282_v35  ;;  %615 = vrcp.f32 %v826_v45  ;;  %vm296_vm4 = vweird.f32 %v608_v46  ;;  %v359_v7 = vand.u32 2147483647, %v826_v45 }
  0xb7   : > { %v612_v53 = vpop.eup %611  ;;  %v321_v54 = vmul.f32 %v610_v51, %v284_v37  ;;  %617 = vrcp.f32 %v828_v49  ;;  %vm326_vm5 = vweird.f32 %v610_v51  ;;  %vm297_vm7 = vmor %vm295_vm1, %vm296_vm4  ;;  %vm355_vm8 = vweird.f32 %v826_v45 }
  0xb8   : > { %v614_v57 = vpop.eup %613  ;;  %v292_v58 = vsub.f32 1.0, %v291_v52  ;;  %619 = vpow2.f32 %v524_v50  ;;  %v839_v0 = vadd.f32 1.0, %v612_v53  ;;  %v361_v10 = vand.u32 2147483648, %v826_v45  ;;  %vm327_vm9 = vmor %vm325_vm2, %vm326_vm5 }
  0xb9   : > { %v322_v62 = vsub.f32 1.0, %v321_v54  ;;  %v841_v1 = vadd.f32 1.0, %v614_v57  ;;  %621 = vpow2.f32 %v526_v56  ;;  %v389_v13 = vand.u32 2147483647, %v828_v49 }
  0xba   : > { %v293_v63 = vmul.f32 %v608_v46, %v292_v58  ;;  %623 = vrcp.f32 %v839_v0  ;;  %v391_v14 = vand.u32 2147483648, %v828_v49  ;;  %vm868_vm10 = vcmp.eq.f32.partialorder %v359_v7, 8.507059e+37 }
  0xbb   : > { %v323_v2 = vmul.f32 %v610_v51, %v322_v62  ;;  %625 = vrcp.f32 %v841_v1  ;;  %vm385_vm11 = vweird.f32 %v828_v49  ;;  %vm878_vm13 = vcmp.eq.f32.partialorder %v389_v13, 8.507059e+37 }
  0xbc   : > { %v616_v4 = vpop.eup %615  ;;  %v294_v5 = vadd.f32 %v608_v46, %v293_v63  ;;  %v392_v35 = vor.u32 1.1754944e-38, %v391_v14  ;;  %vm310_vm0 = vweird.f32 %v839_v0  ;;  %v314_v40 = vand.u32 2147483647, %v839_v0 }
  0xbd   : > { %v324_v8 = vadd.f32 %v610_v51, %v323_v2  ;;  %v351_v9 = vmul.f32 %v616_v4, %v826_v45  ;;  %v618_v11 = vpop.eup %617  ;;  %vm356_vm12 = vweird.f32 %v616_v4  ;;  %v316_v45 = vand.u32 2147483648, %v839_v0 }
  0xbe   : > { %v298_v12 = vsel %vm297_vm7, %v608_v46, %v294_v5  ;;  %v620_v15 = vpop.eup %619  ;;  %v381_v21 = vmul.f32 %v618_v11, %v828_v49  ;;  %vm386_vm14 = vweird.f32 %v618_v11  ;;  %vm357_vm15 = vmor %vm355_vm8, %vm356_vm12  ;;  %v344_v56 = vand.u32 2147483647, %v841_v1 }
  0xbf   : > { %v303_v16 = vsel %vm835_vm3, %v302_v61, %v298_v12  ;;  %v328_v17 = vsel %vm327_vm9, %v610_v51, %v324_v8  ;;  %v352_v18 = vsub.f32 1.0, %v351_v9  ;;  %v622_v27 = vpop.eup %621  ;;  %v882_v36 = vadd.f32 1.0, %v620_v15  ;;  %vm387_vm1 = vmor %vm385_vm11, %vm386_vm14 }
  0xc0   : > { %v410_v22 = vmul.f32 %v303_v16, %v804_v19  ;;  %v333_v23 = vsel %vm843_vm6, %v332_v6, %v328_v17  ;;  %v382_v32 = vsub.f32 1.0, %v381_v21  ;;  %v624_v33 = vpop.eup %623  ;;  %v362_v19 = vor.u32 1.1754944e-38, %v361_v10 }
  0xc1   : > { %v412_v28 = vmul.f32 %v333_v23, %v806_v20  ;;  %v353_v31 = vmul.f32 %v616_v4, %v352_v18  ;;  %v306_v38 = vmul.f32 %v624_v33, %v839_v0  ;;  %v626_v39 = vpop.eup %625  ;;  %627 = vrcp.f32 %v882_v36 }
  0xc2   : > { %418 = vst [vmem:[%s875_s4] sm:$0xff] %v410_v22  ;;  %v383_v20 = vmul.f32 %v618_v11, %v382_v32  ;;  %v892_v42 = vadd.f32 1.0, %v622_v27  ;;  %v336_v48 = vmul.f32 %v626_v39, %v841_v1  ;;  %vm311_vm2 = vweird.f32 %v624_v33 }
  0xc3   : > { %420 = vst [vmem:[%s875_s4 + $0x10] sm:$0xff] %v412_v28  ;;  %v354_v37 = vadd.f32 %v616_v4, %v353_v31  ;;  %v307_v47 = vsub.f32 1.0, %v306_v38  ;;  %vm340_vm3 = vweird.f32 %v841_v1  ;;  %v346_v57 = vand.u32 2147483648, %v841_v1  ;;  %vm312_vm5 = vmor %vm310_vm0, %vm311_vm2 }
  0xc4   : > { %v384_v46 = vadd.f32 %v618_v11, %v383_v20  ;;  %v337_v54 = vsub.f32 1.0, %v336_v48  ;;  %629 = vrcp.f32 %v892_v42  ;;  %vm341_vm4 = vweird.f32 %v626_v39 }
  0xc5   : > { %v358_v44 = vsel %vm357_vm15, %v616_v4, %v354_v37  ;;  %v308_v53 = vmul.f32 %v624_v33, %v307_v47  ;;  %v317_v60 = vor.u32 1.1754944e-38, %v316_v45  ;;  %vm315_vm6 = vcmp.eq.f32.partialorder %v314_v40, 8.507059e+37  ;;  %vm342_vm7 = vmor %vm340_vm3, %vm341_vm4 }
  0xc6   : > { %v363_v50 = vsel %vm868_vm10, %v362_v19, %v358_v44  ;;  %v388_v52 = vsel %vm387_vm1, %v618_v11, %v384_v46  ;;  %v338_v59 = vmul.f32 %v626_v39, %v337_v54  ;;  %vm345_vm8 = vcmp.eq.f32.partialorder %v344_v56, 8.507059e+37 }
  0xc7   : > { %v414_v51 = vmul.f32 %v363_v50, %v810_v25  ;;  %v393_v55 = vsel %vm878_vm13, %v392_v35, %v388_v52  ;;  %v309_v58 = vadd.f32 %v624_v33, %v308_v53  ;;  %v628_v25 = vpop.eup %627  ;;  %v374_v7 = vand.u32 2147483647, %v882_v36 }
  0xc8   : > { %v416_v49 = vmul.f32 %v393_v55, %v812_v26  ;;  %v339_v62 = vadd.f32 %v626_v39, %v338_v59  ;;  %v366_v63 = vmul.f32 %v628_v25, %v882_v36  ;;  %v347_v26 = vor.u32 1.1754944e-38, %v346_v57 }
  0xc9   : > { %422 = vst [vmem:[%s875_s4 + $0x20] sm:$0xff] %v414_v51  ;;  %v313_v61 = vsel %vm312_vm5, %v624_v33, %v309_v58  ;;  %v376_v8 = vand.u32 2147483648, %v882_v36  ;;  %vm371_vm9 = vweird.f32 %v628_v25  ;;  %vm370_vm10 = vweird.f32 %v882_v36 }
  0xca   : > { %424 = vst [vmem:[%s875_s4 + $0x30] sm:$0xff] %v416_v49  ;;  %v318_v2 = vsel %vm315_vm6, %v317_v60, %v313_v61  ;;  %v343_v4 = vsel %vm342_vm7, %v626_v39, %v339_v62  ;;  %v367_v0 = vsub.f32 1.0, %v366_v63  ;;  %v630_v5 = vpop.eup %629  ;;  %vm372_vm11 = vmor %vm370_vm10, %vm371_vm9  ;;  %vm375_vm12 = vcmp.eq.f32.partialorder %v374_v7, 8.507059e+37 }
  0xcb   : > { %v411_v3 = vmul.f32 %v318_v2, %v814_v29  ;;  %v348_v6 = vsel %vm345_vm8, %v347_v26, %v343_v4  ;;  %v396_v1 = vmul.f32 %v630_v5, %v892_v42  ;;  %v377_v12 = vor.u32 1.1754944e-38, %v376_v8 }
  0xcc   : > { %v413_v9 = vmul.f32 %v348_v6, %v816_v30  ;;  %v368_v10 = vmul.f32 %v628_v25, %v367_v0  ;;  %v406_v13 = vand.u32 2147483648, %v892_v42  ;;  %vm401_vm13 = vweird.f32 %v630_v5 }
  0xcd   : > { %419 = vst [vmem:[%s875_s4 + $0x8] sm:$0xff] %v411_v3  ;;  %v397_v29 = vsub.f32 1.0, %v396_v1  ;;  %v404_v15 = vand.u32 2147483647, %v892_v42  ;;  %vm400_vm14 = vweird.f32 %v892_v42 }
  0xce   : > { %421 = vst [vmem:[%s875_s4 + $0x18] sm:$0xff] %v413_v9  ;;  %v369_v11 = vadd.f32 %v628_v25, %v368_v10  ;;  %vm402_vm15 = vmor %vm400_vm14, %vm401_vm13  ;;  %v407_v21 = vor.u32 1.1754944e-38, %v406_v13 }
  0xcf   : > { %v398_v14 = vmul.f32 %v630_v5, %v397_v29  ;;  %vm405_vm0 = vcmp.eq.f32.partialorder %v404_v15, 8.507059e+37 }
  0xd0   : > { %v373_v30 = vsel %vm372_vm11, %v628_v25, %v369_v11 }
  0xd1   : > { %v378_v16 = vsel %vm375_vm12, %v377_v12, %v373_v30  ;;  %v399_v18 = vadd.f32 %v630_v5, %v398_v14 }
  0xd2   : > { %v415_v17 = vmul.f32 %v378_v16, %v822_v41 }
  0xd3   : > { %v403_v22 = vsel %vm402_vm15, %v630_v5, %v399_v18 }
  0xd4   : > { %423 = vst [vmem:[%s875_s4 + $0x28] sm:$0xff] %v415_v17  ;;  %v408_v23 = vsel %vm405_vm0, %v407_v21, %v403_v22 }
  0xd5   : > { %v417_v24 = vmul.f32 %v408_v23, %v824_v43 }
  0xd7   : > { %425 = vst [vmem:[%s875_s4 + $0x38] sm:$0xff] %v417_v24 }
  0xd8   : > { %658 = shalt.err (!%p655_p3)
}
  0xd9   : > { %s695_s27 = smov 128   ;;  %s696_s28 = smov 8  }
  0xda   : > { %557 = dma.vmem_to_hbm [thread:$0]  (%p755_p5), %s440_s16, 1024, %s442_s9, %s427_s10, %s695_s27, %s695_s27, %s696_s28  }
  0xdb PF: > { %p563_p4 = scmp.ge.s32.totalorder %s693_s15, 2  ;;  %s456_s29 = sand.u32 1, %s681_s12  }
  0xdc   : > { %s457_s30 = scalar_lea.sflag [#allocation3], %s456_s29 }
  0xdd   : > { %p560_p7 = pnand %p563_p4, %p759_p6 }
  0xdf   : > { %p561_p8 = pneg %p560_p7 }
  0xe1   : > { %676 = dma.done.wait (%p561_p8), %s457_s30, 1024  }
  0xe2   : > { %678 = vsyncadd (%p561_p8), %s457_s30, 4294966272  ;;  %p13_p9 = scmp.ge.s32.totalorder %s742_s18, 4   ;;  %s979_s12 = smov %s685_s13 }
  0xe3   : > { %s980_s13 = smov %s689_s14  ;;  %s981_s14 = smov %s753_s21 }
  0xe4   : > { %s982_s15 = smov %s742_s18  ;;  %15 = sbr.rel (!%p13_p9) target bundleno = 3 (0x3), region = 67 }
  0xe9   :  { %463 = vsyncpa [#allocation3], 1 }
  0xea   :  { %465 = vsyncpa [#allocation3 + $0x1], 1 }

</bundles_post_ra>
